<compile_context>
chip_gen: v6e
topology: v6e:2x2x1
jax: 0.10.0
libtpu: 0.0.40
codegen_flags: <defaults>
</compile_context>

<pallas_src>
import math

import jax
import jax.numpy as jnp
from jax.experimental import pallas as pl
from jax.experimental.pallas import tpu as pltpu


def _round_up(x, m):
    return ((x + m - 1) // m) * m


def _vmem_budget_bytes():
    # Generation-aware budget: 128 MiB VMEM on v5e/v6e, 64 MiB per TC on v7x.
    cap = 64 * 1024 * 1024  # conservative (v7x) fallback
    try:
        info = pltpu.get_tpu_info()
        cap = int(getattr(info, "vmem_capacity_bytes", cap)) or cap
    except Exception:
        pass
    return int(cap * 0.7)  # headroom for compiler scratch / double buffering


def _linear_resident_kernel(x_ref, w_ref, b_ref, o_ref):
    # One (tm, Cp) output slab per grid step: full-K MXU dot with the weight
    # resident in VMEM for the whole grid, f32 accumulation, bias add on VPU.
    acc = jnp.dot(x_ref[...], w_ref[...], preferred_element_type=jnp.float32)
    o_ref[...] = (acc + b_ref[...]).astype(o_ref.dtype)


def _linear_ktiled_kernel(x_ref, w_ref, b_ref, o_ref, acc_ref):
    # K-tiled path: accumulate partial products in an f32 VMEM scratch.
    k = pl.program_id(2)

    @pl.when(k == 0)
    def _init():
        acc_ref[...] = jnp.zeros_like(acc_ref)

    acc_ref[...] += jnp.dot(x_ref[...], w_ref[...],
                            preferred_element_type=jnp.float32)

    @pl.when(k == pl.num_programs(2) - 1)
    def _finalize():
        o_ref[...] = (acc_ref[...] + b_ref[...]).astype(o_ref.dtype)


def linear(x, w, b, *, tm=512, tn=256, tk=512, force_k_tiling=False):
    """out = x @ w + b  (PyTorch Linear.forward; fc_w_b == pass that (w, b))."""
    N, K = x.shape
    Kw, C = w.shape
    assert K == Kw, "x / w contraction dims must match"
    assert b.shape == (C,), "bias must have shape (out_dim,)"
    out_dtype = x.dtype

    itemsize = jnp.dtype(x.dtype).itemsize
    wb = jnp.dtype(w.dtype).itemsize
    ob = jnp.dtype(out_dtype).itemsize
    # bf16/f16 pack two rows per sublane -> row tiles aligned to 16, f32 to 8.
    sub = 16 if itemsize == 2 else 8

    # Lane-dense output: pad only the (small) w / b column dim to a multiple of
    # 128 so stores are full unmasked vst.  x and the row dim are never padded.
    Cp = _round_up(C, 128)

    budget = _vmem_budget_bytes()

    # Row tile: large (streaming is HBM-bound), clamped to the problem, aligned
    # to the sublane packing.  Split into >= 2 row tiles when possible so the
    # "parallel" grid axis can be sharded across v7x's two TensorCores.
    tm = max(sub, min(_round_up(tm, sub), _round_up(N, sub)))
    if pl.cdiv(N, tm) < 2 and N > sub:
        tm = _round_up(pl.cdiv(N, 2), sub)

    # Bias kept in f32 (cheap, exact); pad w / b columns to Cp.
    b2 = b.reshape(1, C).astype(jnp.float32)
    bp = jnp.pad(b2, ((0, 0), (0, Cp - C))) if Cp != C else b2
    wp = jnp.pad(w, ((0, 0), (0, Cp - C))) if Cp != C else w

    def resident_bytes(tm_):
        # double-buffered x tile + resident weight + double-buffered out + bias
        return (2 * tm_ * K * itemsize + K * Cp * wb
                + 2 * tm_ * Cp * ob + 2 * Cp * 4)

    use_resident = (not force_k_tiling) and resident_bytes(tm) <= budget

    if use_resident:
        # ---- Path A: weight fully resident in VMEM, x streamed once. --------
        grid = (pl.cdiv(N, tm),)  # boundary row block masked on store
        out = pl.pallas_call(
            _linear_resident_kernel,
            out_shape=jax.ShapeDtypeStruct((N, Cp), out_dtype),
            grid_spec=pltpu.PrefetchScalarGridSpec(
                num_scalar_prefetch=0,
                grid=grid,
                in_specs=[
                    pl.BlockSpec((tm, K), lambda i: (i, 0)),   # x: streamed rows
                    pl.BlockSpec((K, Cp), lambda i: (0, 0)),   # w: fetched once
                    pl.BlockSpec((1, Cp), lambda i: (0, 0)),   # b: fetched once
                ],
                out_specs=pl.BlockSpec((tm, Cp), lambda i: (i, 0)),
            ),
            compiler_params=pltpu.CompilerParams(
                dimension_semantics=("parallel",),
                vmem_limit_bytes=budget,
            ),
        )(x, wp, bp)
    else:
        # ---- Path B: K-tiled accumulator (large K * C) -----------------------
        # Column tile: multiple of 128 that divides Cp (no extra column waste).
        tn = min(tn, Cp)
        tn = max(128, (tn // 128) * 128)
        while Cp % tn:
            tn -= 128

        # K tile: multiple of 128 that divides K.  Only in the rare large-K,
        # non-128-multiple case is K zero-padded (numerically exact).
        xk, wk, Kp = x, wp, K
        if K % 128 != 0 and K > tk:
            Kp = _round_up(K, 128)
            xk = jnp.pad(x, ((0, 0), (0, Kp - K)))
            wk = jnp.pad(wp, ((0, Kp - K), (0, 0)))
        if Kp <= tk or Kp % 128 != 0:
            tk = Kp  # single K step (block == full contraction dim)
        else:
            tk = max(128, (tk // 128) * 128)
            while Kp % tk:
                tk -= 128

        def ktiled_bytes(tm_):
            return (2 * tm_ * tk * itemsize + 2 * tk * tn * wb
                    + 2 * tm_ * tn * ob + tm_ * tn * 4 + 2 * tn * 4)

        # Shrink the row tile if the per-generation budget (tightest on v7x)
        # would be exceeded; footprint is constant in K thanks to K-tiling.
        while tm > sub and ktiled_bytes(tm) > budget:
            tm = max(sub, _round_up(tm // 2, sub))

        # TODO(synk): if profiling shows exposed DMA on the x stream, bump the
        # x BlockSpec to pipeline_mode=pl.Buffered(3).
        grid = (pl.cdiv(N, tm), Cp // tn, Kp // tk)
        out = pl.pallas_call(
            _linear_ktiled_kernel,
            out_shape=jax.ShapeDtypeStruct((N, Cp), out_dtype),
            grid_spec=pltpu.PrefetchScalarGridSpec(
                num_scalar_prefetch=0,
                grid=grid,
                in_specs=[
                    pl.BlockSpec((tm, tk), lambda i, j, k: (i, k)),
                    pl.BlockSpec((tk, tn), lambda i, j, k: (k, j)),
                    pl.BlockSpec((1, tn), lambda i, j, k: (0, j)),
                ],
                out_specs=pl.BlockSpec((tm, tn), lambda i, j, k: (i, j)),
                scratch_shapes=[pltpu.VMEM((tm, tn), jnp.float32)],
            ),
            compiler_params=pltpu.CompilerParams(
                dimension_semantics=("parallel", "parallel", "arbitrary"),
                vmem_limit_bytes=budget,
            ),
        )(xk, wk, bp)

    # Rows were never padded; only the cheap lane-padding columns (if any) are
    # sliced off.
    return out if Cp == C else out[:, :C]


if __name__ == "__main__":
    key = jax.random.PRNGKey(0)
    kx, kw, kw2, kb2, kx3, kw3, kb3 = jax.random.split(key, 7)

    # --- Meta-GNN Linear toy shape: N nodes, in_dim -> out_dim ---------------
    N, C_IN, C_OUT = 128, 32, 64
    x = jax.random.normal(kx, (N, C_IN), dtype=jnp.float32)

    # Module parameters: w ~ xavier_normal_ (reset_parameters), b = zeros.
    xavier_std = math.sqrt(2.0 / (C_IN + C_OUT))
    w = xavier_std * jax.random.normal(kw, (C_IN, C_OUT), dtype=jnp.float32)
    b = jnp.zeros((C_OUT,), dtype=jnp.float32)

    out = jax.block_until_ready(linear(x, w, b))
    ref = x @ w + b[None, :]
    assert out.shape == (N, C_OUT)
    assert jnp.allclose(out, ref, atol=1e-4, rtol=1e-4), "mismatch (self w/b)"

    # fc_w_b branch: externally supplied (w, b) — same kernel, different params.
    w2 = 0.1 * jax.random.normal(kw2, (C_IN, C_OUT), dtype=jnp.float32)
    b2 = jax.random.normal(kb2, (C_OUT,), dtype=jnp.float32)
    out2 = jax.block_until_ready(linear(x, w2, b2))
    ref2 = x @ w2 + b2[None, :]
    assert jnp.allclose(out2, ref2, atol=1e-4, rtol=1e-4), "mismatch (fc_w_b)"

    # Exercise the K-tiled accumulator path (normally used only when the
    # resident-weight footprint would not fit VMEM) on a small shape.
    N3, K3, C3 = 200, 256, 192
    x3 = jax.random.normal(kx3, (N3, K3), dtype=jnp.float32)
    w3 = 0.05 * jax.random.normal(kw3, (K3, C3), dtype=jnp.float32)
    b3 = jax.random.normal(kb3, (C3,), dtype=jnp.float32)
    out3 = jax.block_until_ready(
        linear(x3, w3, b3, tn=128, tk=128, force_k_tiling=True))
    ref3 = x3 @ w3 + b3[None, :]
    assert out3.shape == (N3, C3)
    assert jnp.allclose(out3, ref3, atol=1e-4, rtol=1e-4), "mismatch (K-tiled)"

    print("KERNEL_OK")
</pallas_src>

<mosaic_0001>
module attributes {stable_mosaic.version = 11 : i64} {
  func.func @_linear_resident_kernel(%arg0: i32, %arg1: memref<64x32xf32, #tpu.memory_space<vmem>>, %arg2: memref<32x128xf32, #tpu.memory_space<vmem>>, %arg3: memref<1x128xf32, #tpu.memory_space<vmem>>, %arg4: memref<64x128xf32, #tpu.memory_space<vmem>>) attributes {dimension_semantics = [#tpu.dimension_semantics<parallel>], iteration_bounds = array<i64: 2>, scalar_prefetch = 0 : i64, scratch_operands = 0 : i64, tpu.core_type = #tpu.core_type<tc>, window_params = [{transform_indices = @transform_0, window_bounds = array<i64: 64, 32>}, {pipeline_mode = #tpu.pipeline_mode<synchronous>, transform_indices = @transform_1, window_bounds = array<i64: 32, 128>}, {pipeline_mode = #tpu.pipeline_mode<synchronous>, transform_indices = @transform_2, window_bounds = array<i64: 1, 128>}, {transform_indices = @transform_3, window_bounds = array<i64: 64, 128>}]} {
    %c0 = arith.constant 0 : index
    %c0_0 = arith.constant 0 : index
    %0 = vector.load %arg1[%c0, %c0_0] : memref<64x32xf32, #tpu.memory_space<vmem>>, vector<64x32xf32>
    %c0_1 = arith.constant 0 : index
    %c0_2 = arith.constant 0 : index
    %1 = vector.load %arg2[%c0_1, %c0_2] : memref<32x128xf32, #tpu.memory_space<vmem>>, vector<32x128xf32>
    %cst = arith.constant dense<0.000000e+00> : vector<64x128xf32>
    %2 = tpu.matmul %0, %1, %cst {dimension_numbers = #tpu.dot_dimension_numbers<[1], [0], [0], [1], [0, 0, 1, 1], [], []>} : vector<64x32xf32>, vector<32x128xf32>, vector<64x128xf32> -> vector<64x128xf32>
    %c0_3 = arith.constant 0 : index
    %c0_4 = arith.constant 0 : index
    %3 = vector.load %arg3[%c0_3, %c0_4] : memref<1x128xf32, #tpu.memory_space<vmem>>, vector<1x128xf32>
    %4 = vector.broadcast %3 : vector<1x128xf32> to vector<64x128xf32>
    %5 = arith.addf %2, %4 : vector<64x128xf32>
    %c0_5 = arith.constant 0 : index
    %c0_6 = arith.constant 0 : index
    %6 = vector.load %arg4[%c0_5, %c0_6] : memref<64x128xf32, #tpu.memory_space<vmem>>, vector<64x128xf32>
    tpu.vector_store %arg4[%c0_5, %c0_6], %5 {strides = array<i32>} : memref<64x128xf32, #tpu.memory_space<vmem>>, vector<64x128xf32>,
    return
  }
  func.func @transform_0(%arg0: i32) -> (i32, i32) {
    %c0_i32 = arith.constant 0 : i32
    %c0_i32_0 = arith.constant 0 : i32
    return %arg0, %c0_i32 : i32, i32
  }
  func.func @transform_1(%arg0: i32) -> (i32, i32) {
    %c0_i32 = arith.constant 0 : i32
    %c0_i32_0 = arith.constant 0 : i32
    %c0_i32_1 = arith.constant 0 : i32
    return %c0_i32, %c0_i32_0 : i32, i32
  }
  func.func @transform_2(%arg0: i32) -> (i32, i32) {
    %c0_i32 = arith.constant 0 : i32
    %c0_i32_0 = arith.constant 0 : i32
    %c0_i32_1 = arith.constant 0 : i32
    return %c0_i32, %c0_i32_0 : i32, i32
  }
  func.func @transform_3(%arg0: i32) -> (i32, i32) {
    %c0_i32 = arith.constant 0 : i32
    %c0_i32_0 = arith.constant 0 : i32
    return %arg0, %c0_i32 : i32, i32
  }
}

</mosaic_0001>

<bundles_post_ra>
// kernel: tpu_custom_call.1
= control target key start
LH: loop header
LB: loop body
LE: loop exit
PB: predicated region body
PF: predicated region fallthrough
CT: control target
= control target key end

     0   :  { %8 = vsyncpa [#allocation3], 0  ;;  %s721_s0 = inlined_call_operand.vmem [shape: f32[128,32], index: 0, kind: input, shape index: {}]   ;;  %s722_s1 = inlined_call_operand.vmem [shape: f32[32,128], index: 1, kind: input, shape index: {}]   ;;  %s723_s2 = inlined_call_operand.vmem [shape: f32[1,128], index: 2, kind: input, shape index: {}]   ;;  %s724_s3 = inlined_call_operand.hbm [shape: f32[128,128], index: 3, kind: output, shape index: {}]  }
   0x1   :  { %10 = vsyncpa [#allocation3 + $0x1], 0  ;;  %s593_s12 = smov 0   ;;  %s595_s13 = smov 0  }
   0x2   :  { %s597_s14 = smov 0   ;;  %s599_s15 = smov 0  }
   0x3 LB: > { %s614_s16 = sadd.s32 4294967295, %s568_s15   ;;  %s405_s17 = sadd.s32 4294967294, %s568_s15   ;;  %s568_s15 = sphi %s599_s15, %s730_s15   ;;  %s564_s14 = sphi %s597_s14, %s729_s14   ;;  %s560_s13 = sphi %s595_s13, %s728_s13   ;;  %s556_s12 = sphi %s593_s12, %s727_s12  }
   0x4   : > { %s618_s18 = sadd.s32 1, %s568_s15   ;;  %s91_s19 = sadd.s32 1, %s564_s14 }
   0x5   : > { %s88_s20 = ssub.s32 %s568_s15, %s618_s18  ;;  %p101_p0 = scmp.ne.s32.totalorder %s564_s14, %s560_s13 }
   0x6   : > { %p89_p1 = scmp.eq.s32.totalorder %s88_s20, 0  ;;  %p102_p2 = scmp.eq.s32.totalorder %s614_s16, 1 }
   0x7   : > { %p107_p3 = scmp.ne.s32.totalorder %s560_s13, %s556_s12  ;;  %p108_p4 = scmp.eq.s32.totalorder %s405_s17, 1 }
   0x8   : > { %s629_s21 = scalar_select %p89_p1, %s564_s14, %s91_s19  }
   0x9   : > { %p631_p5 = por %p102_p2, %p101_p0  ;;  %p635_p6 = por %p108_p4, %p107_p3 }
   0xa   : > { %p408_p7 = scmp.ge.s32.totalorder %s568_s15, 1  ;;  %p141_p8 = scmp.lt.s32.totalorder %s568_s15, 3 }
   0xc   : > { %p142_p9 = pnand %p408_p7, %p141_p8 }
   0xd   : > { %s410_s28 = sshll.u32 (!%p142_p9), %s614_s16, 3  ;;  %s162_s10 = sand.u32 (!%p142_p9), 1, %s560_s13  }
   0xe   : > { %145 = sbr.rel (%p142_p9) target bundleno = 244 (0xf4), region = 32  ;;  %p166_p10 = scmp.lt.s32.totalorder (!%p142_p9), %s410_s28, 15 }
   0xf   : > { %s409_s11 = sshll.u32 (!%p142_p9), %s162_s10, 6  ;;  %s426_s24 = sshll.u32 (!%p142_p9), %s614_s16, 10 }
  0x10   : > { %s164_s20 = scalar_lea.vmem (!%p142_p9), [#allocation2], %s409_s11  ;;  %s681_s16 = scalar_lea.sflag (!%p142_p9), [#allocation3], %s162_s10 }
  0x11   : > { %s343_s25 = sshll.u32 (!%p142_p9), %s164_s20, 4  ;;  %s570_s30 = smov (!%p142_p9), [#allocation2]   ;;  %s677_s25 = int_to_ptr.vmem [resolvable:$true] %s343_s25 }
  0x12   : > { %s508_s29 = scalar_lea.vmem (!%p142_p9), %s677_s25, 1024  ;;  %s512_s4 = sshll.u32 (!%p142_p9), %s570_s30, 4  ;;  %s513_s4 = int_to_ptr.vmem [resolvable:$false] %s512_s4 }
  0x13   : > { %v183_v0 = vld [vmem:[%s722_s1 + $0x18] sm:$0xff]  ;;  %v182_v1 = vld [vmem:[%s722_s1 + $0x10] sm:$0xff]  ;;  %v181_v2 = vld [vmem:[%s722_s1 + $0x8] sm:$0xff]  ;;  %s732_s28 = smov (!%p166_p10, %s410_s28), 15  ;;  %vm191_vm0 = vcmask 261120   ;;  %p509_p11 = scmp.ne.s32.totalorder %s677_s25, %s508_s29 }
  0x14   : > { %439 = vmatprep.subr.mxu0 %v183_v0  ;;  %459 = vmatprep.subr.mxu1 %v183_v0  ;;  %v180_v3 = vld [vmem:[%s722_s1] sm:$0xff]  ;;  %s411_s6 = sshll.u32 %s732_s28, 3  ;;  %s675_s28 = scalar_lea.hbm %s724_s3, %s426_s24 }
  0x15   : > { %440 = vmatpush3.msra.mxu0 %v183_v0  ;;  %463 = vmatpush3.msra.mxu1 %v183_v0  ;;  %s169_s9 = scalar_lea.vmem %s721_s0, %s411_s6  ;;  %v412_v12 = vld [vmem:[%s723_s2] ss:$0 sm:$0xff]  ;;  %p510_p12 = pnand %p509_p11, %p631_p5 }
  0x16   : > { %441 = vmatprep.subr.mxu0 %v182_v1  ;;  %460 = vmatprep.subr.mxu1 %v182_v1  ;;  %v172_v4 = vld [vmem:[%s169_s9] sm:$0xff]  ;;  %v173_v6 = vld [vmem:[%s169_s9 + $0x8] sm:$0xff]  ;;  %v174_v8 = vld [vmem:[%s169_s9 + $0x10] sm:$0xff]  ;;  %s514_s5 = scalar_lea.vmem %s513_s4, 2048  ;;  %p515_p0 = scmp.lt.s32.totalorder %s677_s25, %s513_s4 }
  0x17   : > { %442 = vmatpush3.msra.mxu0 %v182_v1  ;;  %464 = vmatpush3.msra.mxu1 %v182_v1  ;;  %v176_v5 = vld [vmem:[%s169_s9 + $0x20] sm:$0xff]  ;;  %v177_v7 = vld [vmem:[%s169_s9 + $0x28] sm:$0xff]  ;;  %v178_v9 = vld [vmem:[%s169_s9 + $0x30] sm:$0xff]  ;;  %p511_p13 = pneg %p510_p12  ;;  %p516_p1 = scmp.lt.s32.totalorder %s514_s5, %s508_s29 }
  0x18   : > { %443 = vmatprep.subr.mxu0 %v181_v2  ;;  %461 = vmatprep.subr.mxu1 %v181_v2  ;;  %v175_v10 = vld [vmem:[%s169_s9 + $0x18] sm:$0xff] }
  0x19   : > { %444 = vmatpush3.msra.mxu0 %v181_v2  ;;  %465 = vmatpush3.msra.mxu1 %v181_v2  ;;  %v179_v11 = vld [vmem:[%s169_s9 + $0x38] sm:$0xff]  ;;  %p517_p2 = por %p516_p1, %p515_p0 }
  0x1a   : > { %445 = vmatprep.subr.mxu0 %v180_v3  ;;  %462 = vmatprep.subr.mxu1 %v180_v3 }
  0x1b   : > { %446 = vmatpush3.msra.mxu0 %v180_v3  ;;  %466 = vmatpush3.msra.mxu1 %v180_v3  ;;  %p518_p3 = pnand %p517_p2, %p511_p13 }
  0x1c   : > { %447 = vmatprep.mubr.msk.f32.mxu0 %vm191_vm0, %v172_v4  ;;  %453 = vmatprep.mubr.msk.f32.mxu1 %vm191_vm0, %v176_v5 }
  0x1d   : > { %448 = vmatmul.mubr.msk.f32.vlgmr.msra.gmra.mxu0 %vm191_vm0, %v173_v6  ;;  %454 = vmatmul.mubr.msk.f32.vlgmr.msra.gmra.mxu1 %vm191_vm0, %v177_v7 }
  0x1e   : > { %450 = vmatprep.mubr.msk.f32.mxu0 %vm191_vm0, %v174_v8  ;;  %456 = vmatprep.mubr.msk.f32.mxu1 %vm191_vm0, %v178_v9 }
  0x21   : > { %451 = vmatmul.mubr.msk.f32.gmra.mxu0 %vm191_vm0, %v175_v10  ;;  %457 = vmatmul.mubr.msk.f32.gmra.mxu1 %vm191_vm0, %v179_v11 }
  0xdd   : > { %v449_v13 = vpop.f32.mrf.mxu0  ;;  %v455_v14 = vpop.f32.mrf.mxu1 }
  0xde   : > { %v288_v15 = vadd.f32 %v449_v13, %v412_v12  ;;  %v308_v16 = vadd.f32 %v455_v14, %v412_v12 }
  0xdf   : > { %v282_v17 = vpop.f32.mrf.mxu0  ;;  %v302_v18 = vpop.f32.mrf.mxu1 }
  0xe0   : > { %322 = vst [vmem:[%s164_s20 + $0x8] sm:$0xff] %v288_v15  ;;  %326 = vst [vmem:[%s164_s20 + $0x28] sm:$0xff] %v308_v16  ;;  %v283_v19 = vadd.f32 %v412_v12, %v282_v17  ;;  %v303_v20 = vadd.f32 %v412_v12, %v302_v18 }
  0xe1   : > { %v452_v21 = vpop.f32.mrf.mxu0  ;;  %v458_v22 = vpop.f32.mrf.mxu1 }
  0xe2   : > { %321 = vst [vmem:[%s164_s20] sm:$0xff] %v283_v19  ;;  %325 = vst [vmem:[%s164_s20 + $0x20] sm:$0xff] %v303_v20  ;;  %v298_v23 = vadd.f32 %v452_v21, %v412_v12  ;;  %v318_v24 = vadd.f32 %v458_v22, %v412_v12 }
  0xe3   : > { %v292_v25 = vpop.f32.mrf.mxu0  ;;  %v312_v26 = vpop.f32.mrf.mxu1 }
  0xe4   : > { %324 = vst [vmem:[%s164_s20 + $0x18] sm:$0xff] %v298_v23  ;;  %328 = vst [vmem:[%s164_s20 + $0x38] sm:$0xff] %v318_v24  ;;  %v293_v27 = vadd.f32 %v412_v12, %v292_v25  ;;  %v313_v28 = vadd.f32 %v412_v12, %v312_v26 }
  0xe6   : > { %323 = vst [vmem:[%s164_s20 + $0x10] sm:$0xff] %v293_v27  ;;  %327 = vst [vmem:[%s164_s20 + $0x30] sm:$0xff] %v313_v28 }
  0xe7   : > { %521 = shalt.err (!%p518_p3)
}
  0xe8   : > { %s522_s6 = scalar_lea.hbm %s675_s28, 1024  ;;  %s526_s9 = scalar_lea.hbm %s724_s3, 2048 }
  0xe9   : > { %p523_p4 = scmp.ne.s32.totalorder %s675_s28, %s522_s6  ;;  %p527_p9 = scmp.lt.s32.totalorder %s675_s28, %s724_s3 }
  0xea   : > { %p528_p10 = scmp.lt.s32.totalorder %s526_s9, %s522_s6 }
  0xeb   : > { %p524_p7 = pnand %p523_p4, %p631_p5 }
  0xec   : > { %p529_p11 = por %p528_p10, %p527_p9 }
  0xed   : > { %p525_p8 = pneg %p524_p7 }
  0xef   : > { %p530_p12 = pnand %p529_p11, %p525_p8 }
  0xf1   : > { %533 = shalt.err (!%p530_p12)
}
  0xf2   : > { %s571_s17 = smov 128   ;;  %s572_s19 = smov 8  }
  0xf3   : > { %467 = dma.vmem_to_hbm [thread:$0]  (%p631_p5), %s677_s25, 1024, %s675_s28, %s681_s16, %s571_s17, %s571_s17, %s572_s19  }
  0xf4 PF: > { %p473_p13 = scmp.ge.s32.totalorder %s568_s15, 2  ;;  %s358_s20 = sand.u32 1, %s556_s12  }
  0xf5   : > { %s359_s24 = scalar_lea.sflag [#allocation3], %s358_s20 }
  0xf6   : > { %p470_p0 = pnand %p473_p13, %p635_p6 }
  0xf8   : > { %p471_p1 = pneg %p470_p0 }
  0xfa   : > { %551 = dma.done.wait (%p471_p1), %s359_s24, 1024  }
  0xfb   : > { %553 = vsyncadd (%p471_p1), %s359_s24, 4294966272  ;;  %p13_p2 = scmp.ge.s32.totalorder %s618_s18, 4   ;;  %s727_s12 = smov %s560_s13 }
  0xfc   : > { %s728_s13 = smov %s564_s14  ;;  %s729_s14 = smov %s629_s21 }
  0xfd   : > { %s730_s15 = smov %s618_s18  ;;  %15 = sbr.rel (!%p13_p2) target bundleno = 3 (0x3), region = 67 }
 0x102   :  { %364 = vsyncpa [#allocation3], 1 }
 0x103   :  { %366 = vsyncpa [#allocation3 + $0x1], 1 }

</bundles_post_ra>
